<compile_context>
chip_gen: v6e
topology: v6e:2x2x1
jax: 0.10.0
libtpu: 0.0.40
codegen_flags: <defaults>
</compile_context>

<pallas_src>
import jax
import jax.numpy as jnp
from jax.experimental import pallas as pl
from jax.experimental.pallas import tpu as pltpu


_DEFAULT_BLOCK_BYTES = 2 * 1024 * 1024   # ~2 MiB per x/out block (emb block is smaller)
_VMEM_LIMIT_BYTES = 48 * 1024 * 1024     # headroom, still < v7x's 64 MiB physical VMEM


def _add_pos_kernel(x_ref, emb_ref, o_ref):
    # Pure VPU broadcast-add; works for both layouts:
    #   3-D path:        x (1, tS, D) + emb (tS, D)
    #   lane-dense path: x (tB, tC)   + emb (1, tC)
    o_ref[...] = x_ref[...] + emb_ref[...]


def _pick_tile(total, unit, max_elems):
    """Largest multiple of `unit` that divides `total` and is <= max_elems.
    Returns `total` itself if it is not a multiple of `unit` (full-dim block)."""
    if total % unit != 0:
        return total
    cap = min(total, max(unit, (max_elems // unit) * unit))
    t = cap
    while t >= unit:
        if total % t == 0:
            return t
        t -= unit
    return unit


def _pallas_add(x_arr, emb_arr, grid, x_spec, emb_spec, out_spec, donate_x):
    kwargs = {}
    if donate_x:
        kwargs["input_output_aliases"] = {0: 0}
    return pl.pallas_call(
        _add_pos_kernel,
        out_shape=jax.ShapeDtypeStruct(x_arr.shape, x_arr.dtype),
        grid_spec=pltpu.PrefetchScalarGridSpec(
            num_scalar_prefetch=0,
            grid=grid,
            in_specs=[x_spec, emb_spec],
            out_specs=out_spec,
        ),
        compiler_params=pltpu.CompilerParams(
            dimension_semantics=("parallel",) * len(grid),
            vmem_limit_bytes=_VMEM_LIMIT_BYTES,
        ),
        **kwargs,
    )(x_arr, emb_arr)


def positional_encoding(x, emb_table, *,
                        target_block_bytes=_DEFAULT_BLOCK_BYTES,
                        donate_x=False):
    """out = x + emb_table[0:seq_len]  (broadcast over batch).

    x:         [B, S, D] (batched) or [S, D] (unbatched, PyTorch batched=False)
    emb_table: [num_positions, D] with num_positions >= S
    """
    squeeze_batch = (x.ndim == 2)
    if squeeze_batch:
        x = x[None]
    B, S, D = x.shape
    P, D2 = emb_table.shape
    if D != D2:
        raise ValueError(f"d_model mismatch: x has {D}, emb_table has {D2}")
    if S > P:
        raise ValueError(f"seq_len {S} exceeds num_positions {P}")

    # One-time cast outside the kernel (table is tiny) so the per-step work is
    # only the add; add happens in x's dtype, matching the module's usual setup.
    emb_table = emb_table.astype(x.dtype)

    itemsize = x.dtype.itemsize
    sub = 8 * max(1, 4 // itemsize)          # sublane multiple: f32->8, bf16->16, int8->32

    if D % 128 != 0 and (S * D) % 128 == 0:
        # --- lane-dense path: flatten (S, D) row-major so the lane dim is a
        # multiple of 128 (no masked vst.msk partial stores when d_model < 128).
        # Row-major flattening keeps x[b, s, d] aligned with emb_flat[0, s*D + d],
        # so the first S*D columns of the flattened table are exactly emb[0:S].
        N = S * D
        x2 = x.reshape(B, N)
        emb_flat = emb_table.reshape(1, P * D)
        if B * 128 * itemsize <= target_block_bytes:
            tB = B
        else:
            tB = _pick_tile(B, sub, max(sub, target_block_bytes // (128 * itemsize)))
        tC = _pick_tile(N, 128, max(128, target_block_bytes // (tB * itemsize)))
        grid = (N // tC, B // tB)            # batch innermost: emb block stays resident
        out2 = _pallas_add(
            x2, emb_flat, grid,
            x_spec=pl.BlockSpec((tB, tC), lambda c, b: (b, c)),
            emb_spec=pl.BlockSpec((1, tC), lambda c, b: (0, c)),
            out_spec=pl.BlockSpec((tB, tC), lambda c, b: (b, c)),
            donate_x=donate_x,
        )
        out = out2.reshape(B, S, D)
    else:
        # --- native 3-D path (already lane-dense when D % 128 == 0).
        tS = _pick_tile(S, sub, max(sub, target_block_bytes // (D * itemsize)))
        grid = (S // tS, B)                  # batch innermost: emb block stays resident
        out = _pallas_add(
            x, emb_table, grid,
            x_spec=pl.BlockSpec((1, tS, D), lambda s, b: (b, s, 0)),
            emb_spec=pl.BlockSpec((tS, D), lambda s, b: (s, 0)),
            out_spec=pl.BlockSpec((1, tS, D), lambda s, b: (b, s, 0)),
            donate_x=donate_x,
        )

    if squeeze_batch:
        out = out[0]
    return out


if __name__ == "__main__":
    key = jax.random.PRNGKey(0)

    def check(B, S, D, P, *, unbatched=False, **kw):
        kx, ke = jax.random.split(jax.random.fold_in(key, B * 100000 + S * 1000 + D))
        shape = (S, D) if unbatched else (B, S, D)
        x = jax.random.normal(kx, shape, dtype=jnp.float32)
        emb = jax.random.normal(ke, (P, D), dtype=jnp.float32)  # ~ nn.Embedding N(0,1) init
        out = jax.block_until_ready(positional_encoding(x, emb, **kw))
        ref = x + (emb[:S] if unbatched else emb[:S][None, :, :])
        assert out.shape == x.shape and out.dtype == x.dtype
        assert jnp.allclose(out, ref, atol=1e-6), ("mismatch", B, S, D, P)

    # Module-implied demo shapes: d_model=32, num_positions=20, seq=8, batch=2
    # (lane-dense path, single block — at this size the op is pure launch overhead).
    check(2, 8, 32, 20)
    # Multi-tile lane-dense path (tiny block budget to force a real grid: 4 col tiles).
    check(2, 64, 32, 64, target_block_bytes=4096)
    # Native 3-D path (d_model multiple of 128), tiled over seq and batch (4x4 grid).
    check(4, 32, 128, 48, target_block_bytes=4096)
    # Unbatched (PyTorch batched=False) mode.
    check(1, 8, 32, 20, unbatched=True)

    print("KERNEL_OK")
</pallas_src>

<mosaic_0001>
module attributes {stable_mosaic.version = 11 : i64} {
  func.func @_add_pos_kernel(%arg0: i32, %arg1: i32, %arg2: memref<2x256xf32, #tpu.memory_space<vmem>>, %arg3: memref<1x256xf32, #tpu.memory_space<vmem>>, %arg4: memref<2x256xf32, #tpu.memory_space<vmem>>) attributes {dimension_semantics = [#tpu.dimension_semantics<parallel>, #tpu.dimension_semantics<parallel>], iteration_bounds = array<i64: 1, 1>, scalar_prefetch = 0 : i64, scratch_operands = 0 : i64, tpu.core_type = #tpu.core_type<tc>, window_params = [{transform_indices = @transform_0, window_bounds = array<i64: 2, 256>}, {transform_indices = @transform_1, window_bounds = array<i64: 1, 256>}, {transform_indices = @transform_2, window_bounds = array<i64: 2, 256>}]} {
    %c0 = arith.constant 0 : index
    %c0_0 = arith.constant 0 : index
    %0 = vector.load %arg2[%c0, %c0_0] : memref<2x256xf32, #tpu.memory_space<vmem>>, vector<2x256xf32>
    %c0_1 = arith.constant 0 : index
    %c0_2 = arith.constant 0 : index
    %1 = vector.load %arg3[%c0_1, %c0_2] : memref<1x256xf32, #tpu.memory_space<vmem>>, vector<1x256xf32>
    %2 = vector.broadcast %1 : vector<1x256xf32> to vector<2x256xf32>
    %3 = arith.addf %0, %2 : vector<2x256xf32>
    %c0_3 = arith.constant 0 : index
    %c0_4 = arith.constant 0 : index
    %4 = vector.load %arg4[%c0_3, %c0_4] : memref<2x256xf32, #tpu.memory_space<vmem>>, vector<2x256xf32>
    tpu.vector_store %arg4[%c0_3, %c0_4], %3 {strides = array<i32>} : memref<2x256xf32, #tpu.memory_space<vmem>>, vector<2x256xf32>,
    return
  }
  func.func @transform_0(%arg0: i32, %arg1: i32) -> (i32, i32) {
    %c0_i32 = arith.constant 0 : i32
    return %arg1, %arg0 : i32, i32
  }
  func.func @transform_1(%arg0: i32, %arg1: i32) -> (i32, i32) {
    %c0_i32 = arith.constant 0 : i32
    %c0_i32_0 = arith.constant 0 : i32
    return %c0_i32, %arg0 : i32, i32
  }
  func.func @transform_2(%arg0: i32, %arg1: i32) -> (i32, i32) {
    %c0_i32 = arith.constant 0 : i32
    return %arg1, %arg0 : i32, i32
  }
}

</mosaic_0001>

<bundles_post_ra>
// kernel: tpu_custom_call.1
= control target key start
LH: loop header
LB: loop body
LE: loop exit
PB: predicated region body
PF: predicated region fallthrough
CT: control target
= control target key end

     0   :  { %7 = vsyncpa [#allocation3], 0  ;;  %s172_s0 = inlined_call_operand.hbm [shape: f32[2,256], index: 0, kind: input, shape index: {}]   ;;  %s173_s1 = inlined_call_operand.hbm [shape: f32[1,640], index: 1, kind: input, shape index: {}]   ;;  %s174_s2 = inlined_call_operand.hbm [shape: f32[2,256], index: 2, kind: output, shape index: {}]  }
   0x1   :  { %8 = vsyncpa [#allocation6], 0 }
   0x2   :  { %9 = vsyncpa [#allocation4], 0  ;;  %s144_s9 = smov [#allocation2]   ;;  %s145_s11 = smov [#allocation5]  }
   0x3   :  { %s16_s10 = sshll.u32 %s144_s9, 4  ;;  %s26_s12 = sshll.u32 %s145_s11, 4  ;;  %s17_s10 = int_to_ptr.vmem [resolvable:$true] %s16_s10  ;;  %s27_s12 = int_to_ptr.vmem [resolvable:$true] %s26_s12 }
   0x4   :  { %s86_s13 = scalar_lea.vmem %s17_s10, 64  ;;  %p91_p1 = scmp.lt.s32.totalorder %s17_s10, %s17_s10 }
   0x5   :  { %p87_p0 = scmp.ne.s32.totalorder %s17_s10, %s86_s13  ;;  %p92_p2 = scmp.lt.s32.totalorder %s86_s13, %s86_s13 }
   0x7   :  { %p93_p3 = por %p92_p2, %p91_p1 }
   0x9   :  { %p94_p4 = pnand %p93_p3, %p87_p0 }
   0xb   :  { %97 = shalt.err (!%p94_p4)
}
   0xc   :  { %19 = dma.hbm_to_vmem [thread:$0]  %s172_s0, 64, %s17_s10, [#allocation3]  }
   0xd   :  { %s106_s16 = scalar_lea.vmem %s27_s12, 32  ;;  %p111_p6 = scmp.lt.s32.totalorder %s27_s12, %s27_s12 }
   0xe   :  { %p107_p5 = scmp.ne.s32.totalorder %s27_s12, %s106_s16  ;;  %p112_p7 = scmp.lt.s32.totalorder %s106_s16, %s106_s16 }
  0x10   :  { %p113_p8 = por %p112_p7, %p111_p6 }
  0x12   :  { %p114_p9 = pnand %p113_p8, %p107_p5 }
  0x14   :  { %117 = shalt.err (!%p114_p9)
}
  0x15   :  { %29 = dma.hbm_to_vmem [thread:$0]  %s173_s1, 32, %s27_s12, [#allocation6]  }
  0x16   :  { %138 = dma.done.wait [#allocation3], 64  }
  0x17   :  { %139 = vsyncadd [#allocation3], 4294967232 }
  0x18   :  { %140 = dma.done.wait [#allocation6], 32  }
  0x19   :  { %141 = vsyncadd [#allocation6], 4294967264  ;;  %v39_v0 = vlaneseq  ;;  %v146_v1 = vmov 1983009808   ;;  %v37_v7 = vld [vmem:[#allocation5] sm:$0x3] }
  0x1a   :  { %v49_v2 = vunpack.c.l.s4 %v146_v1  ;;  %v36_v12 = vld [vmem:[#allocation2] sm:$0xf]  ;;  %s147_s0 = smov [#allocation7]  }
  0x1b   :  { %v40_v3 = vshrl.u32 %v39_v0, 7  ;;  %s64_s19 = sshll.u32 %s147_s0, 4  ;;  %s65_s19 = int_to_ptr.vmem [resolvable:$true] %s64_s19 }
  0x1c   :  { %v50_v6 = vunpack.c.0.s8 %v49_v2  ;;  %s118_s1 = scalar_lea.vmem %s65_s19, 64  ;;  %p123_p11 = scmp.lt.s32.totalorder %s65_s19, %s65_s19 }
  0x1d   :  { %v41_v4 = vsub.s32 0, %v40_v3  ;;  %v45_v5 = vsub.s32 1, %v40_v3  ;;  %p119_p10 = scmp.ne.s32.totalorder %s65_s19, %s118_s1  ;;  %p124_p12 = scmp.lt.s32.totalorder %s118_s1, %s118_s1 }
  0x1e   :  { %v53_v10 = vsub.s32 %v50_v6, %v40_v3 }
  0x1f   :  { %v42_v8 = vrot.slane %v37_v7, %v41_v4  ;;  %v46_v9 = vrot.slane %v37_v7, %v45_v5  ;;  %p125_p13 = por %p124_p12, %p123_p11 }
  0x21   :  { %v47_v11 = vcombine.low %v42_v8, %v46_v9  ;;  %p126_p0 = pnand %p125_p13, %p119_p10 }
  0x23   :  { %v54_v13 = vrot.slane %v47_v11, %v53_v10 }
  0x25   :  { %v56_v14 = vadd.f32 %v54_v13, %v36_v12 }
  0x27   :  { %57 = vst [vmem:[#allocation7] sm:$0xf] %v56_v14 }
  0x28   :  { %129 = shalt.err (!%p126_p0)
}
  0x29   :  { %67 = dma.vmem_to_hbm [thread:$0]  %s65_s19, 64, %s174_s2, [#allocation4]  }
  0x2a   :  { %142 = dma.done.wait [#allocation4], 64  }
  0x2b   :  { %143 = vsyncadd [#allocation4], 4294967232 }
  0x2c   :  { %71 = vsyncpa [#allocation3], 1 }
  0x2d   :  { %72 = vsyncpa [#allocation6], 1 }
  0x2e   :  { %73 = vsyncpa [#allocation4], 1 }

</bundles_post_ra>
